<compile_context>
chip_gen: v7x
topology: tpu7x:2x2x1
jax: 0.10.0
libtpu: 0.0.40
codegen_flags: <defaults>
</compile_context>

<pallas_src>
import jax
import jax.numpy as jnp
from jax.experimental import pallas as pl
from jax.experimental.pallas import tpu as pltpu

IN_F = 500       # fc2 input features (fixed by the module)
OUT_F = 10       # fc2 output features
OUT_PAD = 128    # lane-dense padded output width (cols 10..127 are zero)
DROP_P = 0.5     # F.dropout default probability
TILE_B = 1024    # batch tile: bf16 x-tile ~1 MiB/buffer -> safe on v5e/v7x scoped VMEM


# ----------------------------- kernels --------------------------------------

def _kernel_train(x_ref, m_ref, w_ref, b_ref, o_ref):
    # ReLU + inverted dropout in f32 (v5e-safe elementwise), bf16 into the MXU.
    h = jnp.maximum(x_ref[...].astype(jnp.float32), 0.0)
    h = h * m_ref[...].astype(jnp.float32)            # mask is 0.0 or 1/(1-p)
    y = jnp.dot(h.astype(jnp.bfloat16), w_ref[...],
                preferred_element_type=jnp.float32)
    o_ref[...] = (y + b_ref[...]).astype(o_ref.dtype)


def _kernel_eval(x_ref, w_ref, b_ref, o_ref):
    h = jnp.maximum(x_ref[...].astype(jnp.float32), 0.0)
    y = jnp.dot(h.astype(jnp.bfloat16), w_ref[...],
                preferred_element_type=jnp.float32)
    o_ref[...] = (y + b_ref[...]).astype(o_ref.dtype)


# --------------------------- host-side helpers -------------------------------

def prepare_params(w, b):
    """One-time prep of fc2 params into kernel-friendly layout.

    w: (10, 500) PyTorch nn.Linear layout -> (500, 128) bf16 (cols 10.. zero)
    b: (10,)                              -> (1, 128)  f32
    """
    assert w.shape == (OUT_F, IN_F) and b.shape == (OUT_F,)
    w_t = jnp.zeros((IN_F, OUT_PAD), jnp.float32).at[:, :OUT_F].set(
        w.astype(jnp.float32).T)
    b_p = jnp.zeros((1, OUT_PAD), jnp.float32).at[:, :OUT_F].set(
        b.astype(jnp.float32))
    return w_t.astype(jnp.bfloat16), b_p


def make_dropout_mask(key, batch, p=DROP_P):
    """Inverted-dropout scale mask (0.0 or 1/(1-p)), bf16-exact for p=0.5."""
    # TODO(synk): an in-kernel mask via pltpu.prng_seed/prng_random_bits (seed
    # mixed with pl.program_id) would avoid this extra (B,500) DMA, but those
    # primitives have no CPU/interpret lowering, so the mask is host-generated.
    keep = jax.random.bernoulli(key, 1.0 - p, (batch, IN_F))
    return (keep.astype(jnp.float32) * (1.0 / (1.0 - p))).astype(jnp.bfloat16)


def lenet_classifier_forward(feat, w_p, b_p, mask=None, *, tile_b=TILE_B):
    """feat: (B, 500); w_p/b_p from prepare_params; mask != None => training."""
    B, F = feat.shape
    assert F == IN_F
    training = mask is not None

    # Ideally the upstream encoder already emits bf16; cast here if it didn't.
    x = feat.astype(jnp.bfloat16)

    tb = B if B <= tile_b else tile_b
    grid = (pl.cdiv(B, tb),)

    x_spec = pl.BlockSpec((tb, IN_F), lambda i: (i, 0))
    w_spec = pl.BlockSpec((IN_F, OUT_PAD), lambda i: (0, 0))   # resident
    b_spec = pl.BlockSpec((1, OUT_PAD), lambda i: (0, 0))      # resident
    o_spec = pl.BlockSpec((tb, OUT_PAD), lambda i: (i, 0))

    if training:
        kernel = _kernel_train
        m_spec = pl.BlockSpec((tb, IN_F), lambda i: (i, 0))
        in_specs = [x_spec, m_spec, w_spec, b_spec]
        args = (x, mask.astype(jnp.bfloat16), w_p, b_p)
    else:
        kernel = _kernel_eval
        in_specs = [x_spec, w_spec, b_spec]
        args = (x, w_p, b_p)

    bytes_accessed = (2 * B * IN_F                    # x (bf16)
                      + (2 * B * IN_F if training else 0)   # mask (bf16)
                      + 2 * IN_F * OUT_PAD            # weight (bf16)
                      + 4 * OUT_PAD                   # bias (f32)
                      + 4 * B * OUT_PAD)              # output (f32)
    cost = pl.CostEstimate(flops=2 * B * IN_F * OUT_PAD,
                           transcendentals=0,
                           bytes_accessed=bytes_accessed)

    out = pl.pallas_call(
        kernel,
        out_shape=jax.ShapeDtypeStruct((B, OUT_PAD), jnp.float32),
        grid=grid,
        in_specs=in_specs,
        out_specs=o_spec,
        compiler_params=pltpu.CompilerParams(
            dimension_semantics=("parallel",)),   # shards batch tiles on v7x
        cost_estimate=cost,
    )(*args)

    return out[:, :OUT_F]


# ------------------------------- check ---------------------------------------

if __name__ == "__main__":
    key = jax.random.PRNGKey(0)
    kf, kw, kb, km = jax.random.split(key, 4)

    B = 8
    feat = jax.random.normal(kf, (B, IN_F), dtype=jnp.float32)
    w = jax.random.normal(kw, (OUT_F, IN_F), dtype=jnp.float32) * 0.05  # fc2.weight
    b = jax.random.normal(kb, (OUT_F,), dtype=jnp.float32) * 0.05       # fc2.bias

    w_p, b_p = prepare_params(w, b)   # one-time param prep (hoisted out of fwd)

    # Reference at the same bf16 operand precision the kernel uses (f32 accumulate).
    x16 = feat.astype(jnp.bfloat16).astype(jnp.float32)
    w16 = w.astype(jnp.bfloat16).astype(jnp.float32)

    # Eval mode: dropout is identity; must match the dense reference.
    out_eval = jax.block_until_ready(lenet_classifier_forward(feat, w_p, b_p, mask=None))
    ref_eval = jnp.maximum(x16, 0.0) @ w16.T + b
    assert out_eval.shape == (B, OUT_F)
    assert jnp.allclose(out_eval, ref_eval, atol=1e-3, rtol=1e-3), "eval mismatch"

    # Training mode (module default): inverted dropout with p=0.5.
    mask = make_dropout_mask(km, B)
    out_train = jax.block_until_ready(lenet_classifier_forward(feat, w_p, b_p, mask=mask))
    ref_train = (jnp.maximum(x16, 0.0) * mask.astype(jnp.float32)) @ w16.T + b
    assert out_train.shape == (B, OUT_F)
    assert bool(jnp.all(jnp.isfinite(out_train)))
    assert jnp.allclose(out_train, ref_train, atol=1e-3, rtol=1e-3), "train mismatch"

    print("KERNEL_OK")
</pallas_src>

<mosaic_0001>
module attributes {stable_mosaic.version = 11 : i64} {
  func.func @_kernel_eval(%arg0: i32, %arg1: memref<8x500xbf16, #tpu.memory_space<vmem>>, %arg2: memref<500x128xbf16, #tpu.memory_space<vmem>>, %arg3: memref<1x128xf32, #tpu.memory_space<vmem>>, %arg4: memref<8x128xf32, #tpu.memory_space<vmem>>) attributes {dimension_semantics = [#tpu.dimension_semantics<parallel>], iteration_bounds = array<i64: 1>, scalar_prefetch = 0 : i64, scratch_operands = 0 : i64, tpu.core_type = #tpu.core_type<tc>, window_params = [{transform_indices = @transform_0, window_bounds = array<i64: 8, 500>}, {pipeline_mode = #tpu.pipeline_mode<synchronous>, transform_indices = @transform_1, window_bounds = array<i64: 500, 128>}, {pipeline_mode = #tpu.pipeline_mode<synchronous>, transform_indices = @transform_2, window_bounds = array<i64: 1, 128>}, {transform_indices = @transform_3, window_bounds = array<i64: 8, 128>}]} {
    %c0 = arith.constant 0 : index
    %c0_0 = arith.constant 0 : index
    %0 = vector.load %arg1[%c0, %c0_0] : memref<8x500xbf16, #tpu.memory_space<vmem>>, vector<8x500xbf16>
    %1 = arith.extf %0 : vector<8x500xbf16> to vector<8x500xf32>
    %cst = arith.constant 0.000000e+00 : f32
    %2 = vector.broadcast %cst : f32 to vector<8x500xf32>
    %3 = arith.maximumf %1, %2 : vector<8x500xf32>
    %4 = arith.truncf %3 : vector<8x500xf32> to vector<8x500xbf16>
    %c0_1 = arith.constant 0 : index
    %c0_2 = arith.constant 0 : index
    %5 = vector.load %arg2[%c0_1, %c0_2] : memref<500x128xbf16, #tpu.memory_space<vmem>>, vector<500x128xbf16>
    %cst_3 = arith.constant dense<0.000000e+00> : vector<8x128xf32>
    %6 = tpu.matmul %4, %5, %cst_3 {dimension_numbers = #tpu.dot_dimension_numbers<[1], [0], [0], [1], [0, 0, 1, 1], [], []>} : vector<8x500xbf16>, vector<500x128xbf16>, vector<8x128xf32> -> vector<8x128xf32>
    %c0_4 = arith.constant 0 : index
    %c0_5 = arith.constant 0 : index
    %7 = vector.load %arg3[%c0_4, %c0_5] : memref<1x128xf32, #tpu.memory_space<vmem>>, vector<1x128xf32>
    %8 = vector.broadcast %7 : vector<1x128xf32> to vector<8x128xf32>
    %9 = arith.addf %6, %8 : vector<8x128xf32>
    %c0_6 = arith.constant 0 : index
    %c0_7 = arith.constant 0 : index
    %10 = vector.load %arg4[%c0_6, %c0_7] : memref<8x128xf32, #tpu.memory_space<vmem>>, vector<8x128xf32>
    tpu.vector_store %arg4[%c0_6, %c0_7], %9 {strides = array<i32>} : memref<8x128xf32, #tpu.memory_space<vmem>>, vector<8x128xf32>,
    return
  }
  func.func @transform_0(%arg0: i32) -> (i32, i32) {
    %c0_i32 = arith.constant 0 : i32
    %c0_i32_0 = arith.constant 0 : i32
    return %arg0, %c0_i32 : i32, i32
  }
  func.func @transform_1(%arg0: i32) -> (i32, i32) {
    %c0_i32 = arith.constant 0 : i32
    %c0_i32_0 = arith.constant 0 : i32
    %c0_i32_1 = arith.constant 0 : i32
    return %c0_i32, %c0_i32_0 : i32, i32
  }
  func.func @transform_2(%arg0: i32) -> (i32, i32) {
    %c0_i32 = arith.constant 0 : i32
    %c0_i32_0 = arith.constant 0 : i32
    %c0_i32_1 = arith.constant 0 : i32
    return %c0_i32, %c0_i32_0 : i32, i32
  }
  func.func @transform_3(%arg0: i32) -> (i32, i32) {
    %c0_i32 = arith.constant 0 : i32
    %c0_i32_0 = arith.constant 0 : i32
    return %arg0, %c0_i32 : i32, i32
  }
}

</mosaic_0001>

<bundles_post_ra>
// kernel: tpu_custom_call.1
= control target key start
LH: loop header
LB: loop body
LE: loop exit
PB: predicated region body
PF: predicated region fallthrough
CT: control target
= control target key end

     0   :  { %8 = vsyncpa [#allocation3], 0  ;;  %s679_s0 = inlined_call_operand.hbm [shape: bf16[8,500], index: 0, kind: input, shape index: {}]   ;;  %s680_s1 = inlined_call_operand.hbm [shape: bf16[500,128], index: 1, kind: input, shape index: {}]   ;;  %s681_s2 = inlined_call_operand.vmem [shape: f32[1,128], index: 2, kind: input, shape index: {}]   ;;  %s682_s3 = inlined_call_operand.hbm [shape: f32[8,128], index: 3, kind: output, shape index: {}]  }
   0x1   :  { %9 = vsyncpa [#allocation6], 0 }
   0x2   :  { %10 = vsyncpa [#allocation4], 0  ;;  %s608_s12 = smov [#allocation2]   ;;  %s609_s14 = smov [#allocation5]  }
   0x3   :  { %s17_s13 = sshll.u32 %s608_s12, 4  ;;  %s26_s15 = sshll.u32 %s609_s14, 4  ;;  %s18_s13 = int_to_ptr.vmem [resolvable:$true] %s17_s13  ;;  %s633_s15 = int_to_ptr.vmem [resolvable:$true] %s26_s15 }
   0x4   :  { %s536_s18 = scalar_lea.hbm %s679_s0, 256 }
   0x5   :  { %p537_p0 = scmp.ne.s32.totalorder %s679_s0, %s536_s18  ;;  %p540_p1 = scmp.lt.u32.totalorder %s536_s18, %s679_s0 }
   0x7   :  { %p542_p2 = pnand %p540_p1, %p537_p0 }
   0x9   :  { %545 = shalt.err (!%p542_p2)
}
   0xa   :  { %s546_s23 = scalar_lea.vmem %s18_s13, 256  ;;  %p551_p4 = scmp.lt.s32.totalorder %s18_s13, %s18_s13 }
   0xb   :  { %p547_p3 = scmp.ne.s32.totalorder %s18_s13, %s546_s23  ;;  %p552_p5 = scmp.lt.s32.totalorder %s546_s23, %s546_s23 }
   0xd   :  { %p553_p6 = por %p552_p5, %p551_p4 }
   0xf   :  { %p554_p7 = pnand %p553_p6, %p547_p3 }
  0x11   :  { %557 = shalt.err (!%p554_p7)
}
  0x12   :  { %20 = dma.hbm_to_vmem [thread:$0]  %s679_s0, 256, %s18_s13, [#allocation3]  }
  0x13   :  { %s558_s28 = scalar_lea.hbm %s680_s1, 4032 }
  0x14   :  { %p559_p8 = scmp.ne.s32.totalorder %s680_s1, %s558_s28  ;;  %p562_p9 = scmp.lt.u32.totalorder %s558_s28, %s680_s1 }
  0x16   :  { %p564_p10 = pnand %p562_p9, %p559_p8 }
  0x18   :  { %567 = shalt.err (!%p564_p10)
}
  0x19   :  { %s568_s6 = scalar_lea.vmem %s633_s15, 4032  ;;  %p573_p12 = scmp.lt.s32.totalorder %s633_s15, %s633_s15 }
  0x1a   :  { %p569_p11 = scmp.ne.s32.totalorder %s633_s15, %s568_s6  ;;  %p574_p13 = scmp.lt.s32.totalorder %s568_s6, %s568_s6 }
  0x1c   :  { %p575_p0 = por %p574_p13, %p573_p12 }
  0x1e   :  { %p576_p1 = pnand %p575_p0, %p569_p11 }
  0x20   :  { %579 = shalt.err (!%p576_p1)
}
  0x21   :  { %s610_s0 = smov 64   ;;  %s611_s7 = smov 4  }
  0x22   :  { %32 = dma.hbm_to_vmem [thread:$0]  %s680_s1, 4032, %s633_s15, [#allocation6], %s610_s0, %s610_s0, %s611_s7  }
  0x23   :  { %602 = dma.done.wait [#allocation3], 256  }
  0x24   :  { %603 = vsyncadd [#allocation3], 4294967040 }
  0x25   :  { %604 = dma.done.wait [#allocation6], 4032  }
  0x26   :  { %605 = vsyncadd [#allocation6], 4294963264  ;;  %v504_v0 = vld [vmem:[#allocation5 + $0x40] sm:$0xff]   ;;  %v508_v4 = vld [vmem:[#allocation5 + $0x48] sm:$0xff]   ;;  %vm319_vm0 = vcmask 1041408   ;;  %vm315_vm1 = vcmask 949248  }
  0x27   :  { %v505_v1 = vld [vmem:[#allocation5 + $0xc0] sm:$0xff]   ;;  %454 = vmatprep.subr.bf16.mxu0 %v504_v0  ;;  %v509_v5 = vld [vmem:[#allocation5 + $0xc8] sm:$0xff]   ;;  %v512_v8 = vld [vmem:[#allocation5 + $0x50] sm:$0xff]   ;;  %s612_s11 = smov [#allocation7]  }
  0x28   :  { %v506_v2 = vld [vmem:[#allocation5] sm:$0xff]   ;;  %476 = vmatprep.subr.bf16.mxu1 %v505_v1  ;;  %v510_v6 = vld [vmem:[#allocation5 + $0x8] sm:$0xff]   ;;  %v513_v9 = vld [vmem:[#allocation5 + $0xd0] sm:$0xff]   ;;  %s410_s12 = sshll.u32 %s612_s11, 4  ;;  %s411_s12 = int_to_ptr.vmem [resolvable:$true] %s410_s12 }
  0x29   :  { %v507_v3 = vld [vmem:[#allocation5 + $0x80] sm:$0xff]   ;;  %455 = vmatpush3.bf16.msra.mxu0 %v506_v2  ;;  %v511_v7 = vld [vmem:[#allocation5 + $0x88] sm:$0xff]   ;;  %v514_v10 = vld [vmem:[#allocation5 + $0x10] sm:$0xff]   ;;  %s580_s13 = scalar_lea.vmem %s411_s12, 128  ;;  %p585_p3 = scmp.lt.s32.totalorder %s411_s12, %s411_s12 }
  0x2a   :  { %477 = vmatpush3.bf16.msra.mxu1 %v507_v3  ;;  %456 = vmatprep.subr.bf16.mxu0 %v508_v4  ;;  %v515_v11 = vld [vmem:[#allocation5 + $0x90] sm:$0xff]   ;;  %v516_v12 = vld [vmem:[#allocation5 + $0x58] sm:$0xff]   ;;  %v520_v16 = vld [vmem:[#allocation5 + $0x60] sm:$0xff]   ;;  %p581_p2 = scmp.ne.s32.totalorder %s411_s12, %s580_s13  ;;  %p586_p4 = scmp.lt.s32.totalorder %s580_s13, %s580_s13 }
  0x2b   :  { %478 = vmatprep.subr.bf16.mxu1 %v509_v5  ;;  %v517_v13 = vld [vmem:[#allocation5 + $0xd8] sm:$0xff]   ;;  %v521_v17 = vld [vmem:[#allocation5 + $0xe0] sm:$0xff]   ;;  %v524_v20 = vld [vmem:[#allocation5 + $0x68] sm:$0xff]  }
  0x2c   :  { %v518_v14 = vld [vmem:[#allocation5 + $0x18] sm:$0xff]   ;;  %v522_v18 = vld [vmem:[#allocation5 + $0x20] sm:$0xff]   ;;  %v525_v21 = vld [vmem:[#allocation5 + $0xe8] sm:$0xff]   ;;  %p587_p5 = por %p586_p4, %p585_p3 }
  0x2d   :  { %457 = vmatpush3.bf16.msra.mxu0 %v510_v6  ;;  %v519_v15 = vld [vmem:[#allocation5 + $0x98] sm:$0xff]   ;;  %v523_v19 = vld [vmem:[#allocation5 + $0xa0] sm:$0xff]   ;;  %v526_v22 = vld [vmem:[#allocation5 + $0x28] sm:$0xff]  }
  0x2e   :  { %479 = vmatpush3.bf16.msra.mxu1 %v511_v7  ;;  %458 = vmatprep.subr.bf16.mxu0 %v512_v8  ;;  %v527_v23 = vld [vmem:[#allocation5 + $0xa8] sm:$0xff]   ;;  %v528_v24 = vld [vmem:[#allocation5 + $0x70] sm:$0xff]   ;;  %v532_v28 = vld [vmem:[#allocation5 + $0x78] sm:$0xff]   ;;  %p588_p6 = pnand %p587_p5, %p581_p2 }
  0x2f   :  { %480 = vmatprep.subr.bf16.mxu1 %v513_v9  ;;  %v529_v25 = vld [vmem:[#allocation5 + $0xf0] sm:$0xff]   ;;  %v533_v29 = vld [vmem:[#allocation5 + $0xf8] ss:$0 sps:$4 sm:$0x33]  }
  0x30   :  { %v530_v26 = vld [vmem:[#allocation5 + $0x30] sm:$0xff]   ;;  %v534_v30 = vld [vmem:[#allocation5 + $0x38] sm:$0xff]  }
  0x31   :  { %459 = vmatpush3.bf16.msra.mxu0 %v514_v10  ;;  %v531_v27 = vld [vmem:[#allocation5 + $0xb0] sm:$0xff]   ;;  %v535_v31 = vld [vmem:[#allocation5 + $0xb8] sm:$0xff]  }
  0x32   :  { %481 = vmatpush3.bf16.msra.mxu1 %v515_v11  ;;  %460 = vmatprep.subr.bf16.mxu0 %v516_v12  ;;  %v42_v32 = vld [vmem:[#allocation2] sm:$0xff]  ;;  %v43_v35 = vld [vmem:[#allocation2 + $0x8] sm:$0xff] }
  0x33   :  { %482 = vmatprep.subr.bf16.mxu1 %v517_v13  ;;  %v44_v33 = vunpack.c.l.bf16 %v42_v32  ;;  %v45_v34 = vunpack.c.h.bf16 %v42_v32  ;;  %v46_v36 = vunpack.c.l.bf16 %v43_v35  ;;  %v47_v37 = vunpack.c.h.bf16 %v43_v35  ;;  %v420_v48 = vld [vmem:[%s681_s2] ss:$0 sm:$0xff] }
  0x35   :  { %461 = vmatpush3.bf16.msra.mxu0 %v518_v14  ;;  %v48_v38 = vmax.f32 %v44_v33, 0.0  ;;  %v49_v39 = vmax.f32 %v45_v34, 0.0  ;;  %v51_v40 = vmax.f32 %v47_v37, 0.0  ;;  %v50_v41 = vmax.f32 %v46_v36, 0.0 }
  0x36   :  { %483 = vmatpush3.bf16.msra.mxu1 %v519_v15  ;;  %462 = vmatprep.subr.bf16.mxu0 %v520_v16 }
  0x37   :  { %484 = vmatprep.subr.bf16.mxu1 %v521_v17  ;;  %v53_v42 = vpack.c.bf16 %v49_v39, %v49_v39  ;;  %v52_v43 = vpack.c.bf16 %v48_v38, %v48_v38  ;;  %v55_v44 = vpack.c.bf16 %v51_v40, %v51_v40  ;;  %v54_v45 = vpack.c.bf16 %v50_v41, %v50_v41 }
  0x39   :  { %463 = vmatpush3.bf16.msra.mxu0 %v522_v18  ;;  %355 = vmatprep.mubr.bf16.mxu0 %v53_v42 }
  0x3a   :  { %485 = vmatpush3.bf16.msra.mxu1 %v523_v19  ;;  %464 = vmatprep.subr.bf16.mxu0 %v524_v20 }
  0x3b   :  { %486 = vmatprep.subr.bf16.mxu1 %v525_v21  ;;  %453 = vmatprep.mubr.msk.bf16.mxu1 %vm315_vm1, %v55_v44 }
  0x3d   :  { %465 = vmatpush3.bf16.msra.mxu0 %v526_v22 }
  0x3e   :  { %487 = vmatpush3.bf16.msra.mxu1 %v527_v23  ;;  %466 = vmatprep.subr.bf16.mxu0 %v528_v24 }
  0x3f   :  { %488 = vmatprep.subr.bf16.mxu1 %v529_v25 }
  0x41   :  { %467 = vmatpush3.bf16.msra.mxu0 %v530_v26 }
  0x42   :  { %489 = vmatpush3.bf16.msra.mxu1 %v531_v27  ;;  %468 = vmatprep.subr.bf16.mxu0 %v532_v28 }
  0x43   :  { %498 = vmatprep.subr.msk.bf16.mxu1 %vm319_vm0, %v533_v29 }
  0x45   :  { %469 = vmatpush3.bf16.msra.mxu0 %v534_v30 }
  0x46   :  { %491 = vmatpush3.bf16.msra.mxu1 %v535_v31 }
  0x48   :  { %356 = vmatmul.mubr.bf16.vlgmr.msra.gmra.mrb[0].mxu0 %v52_v43 }
  0x49   :  { %396 = vmatmul.mubr.bf16.vlgmr.msra.gmra.mrb[0].mxu1 %v54_v45 }
 0x11b   :  { %v470_v46 = vpop.f32.mrb[0].mxu0 }
 0x11c   :  { %v492_v47 = vpop.f32.mrb[0].mxu1  ;;  %v471_v49 = vpop.f32.mrb[1].mxu0 }
 0x11d   :  { %v472_v50 = vadd.f32 %v471_v49, %v470_v46  ;;  %v493_v51 = vpop.f32.mrb[1].mxu1  ;;  %v473_v52 = vpop.f32.mrb[2].mxu0 }
 0x11e   :  { %v494_v53 = vadd.f32 %v493_v51, %v492_v47  ;;  %v495_v54 = vpop.f32.mrb[2].mxu1  ;;  %v474_v55 = vpop.f32.mrb[3].mxu0 }
 0x11f   :  { %v358_v56 = vadd.f32 %v472_v50, %v420_v48  ;;  %v496_v57 = vpop.f32.mrb[3].mxu1 }
 0x121   :  { %v398_v58 = vadd.f32 %v494_v53, %v358_v56 }
 0x123   :  { %403 = vst [vmem:[#allocation7] sm:$0xff] %v398_v58 }
 0x124   :  { %591 = shalt.err (!%p588_p6)
}
 0x125   :  { %s592_s15 = scalar_lea.hbm %s682_s3, 128 }
 0x126   :  { %p593_p7 = scmp.ne.s32.totalorder %s682_s3, %s592_s15  ;;  %p596_p8 = scmp.lt.u32.totalorder %s592_s15, %s682_s3 }
 0x128   :  { %p598_p9 = pnand %p596_p8, %p593_p7 }
 0x12a   :  { %601 = shalt.err (!%p598_p9)
}
 0x12b   :  { %413 = dma.vmem_to_hbm [thread:$0]  %s411_s12, 128, %s682_s3, [#allocation4]  }
 0x12c   :  { %606 = dma.done.wait [#allocation4], 128  }
 0x12d   :  { %607 = vsyncadd [#allocation4], 4294967168 }
 0x12e   :  { %417 = vsyncpa [#allocation3], 1 }
 0x12f   :  { %418 = vsyncpa [#allocation6], 1 }
 0x130   :  { %419 = vsyncpa [#allocation4], 1 }

</bundles_post_ra>
